<compile_context>
chip_gen: v7x
topology: tpu7x:2x2x1
jax: 0.10.0
libtpu: 0.0.40
codegen_flags: <defaults>
</compile_context>

<pallas_src>
import functools

import jax
import jax.numpy as jnp
from jax.experimental import pallas as pl
from jax.experimental.pallas import tpu as pltpu


def _ls_ce_kernel(x_ref, tgt_ref, out_ref, *, epsilon: float, num_classes: int,
                  batch: int, block_rows: int):
    i = pl.program_id(0)
    x = x_ref[...].astype(jnp.float32)                       # (TB, Cp)
    tb, cp = x.shape

    col = jax.lax.broadcasted_iota(jnp.int32, (tb, cp), 1)
    class_mask = col < num_classes                            # real (unpadded) classes

    # numerically stable log-sum-exp over real classes only
    xm = jnp.where(class_mask, x, jnp.float32(-1e30))
    m = jnp.max(xm, axis=-1, keepdims=True)                   # (TB, 1)
    lse = m + jnp.log(jnp.sum(jnp.exp(xm - m), axis=-1, keepdims=True))

    # fused weighted reduce: (eps/C) * sum_c x  +  (1-eps) * x[target]
    onehot = (col == tgt_ref[...]).astype(jnp.float32)        # (TB, Cp), tgt (TB, 1)
    w = jnp.where(class_mask, epsilon / num_classes, 0.0) + (1.0 - epsilon) * onehot
    wsum = jnp.sum(x * w, axis=-1, keepdims=True)             # (TB, 1)

    per_row = lse - wsum                                      # (TB, 1)

    # mask padded rows of a ragged last block
    row = i * block_rows + jax.lax.broadcasted_iota(jnp.int32, (tb, 1), 0)
    per_row = jnp.where(row < batch, per_row, 0.0)

    psum = jnp.sum(per_row)
    # lane-dense partial-sum slab; wrapper reads [0, 0] of each block
    out_ref[...] = jnp.broadcast_to(psum, (8, 128)).astype(jnp.float32)


def label_smoothing_cross_entropy(preds, target, epsilon: float = 0.1,
                                  max_block_rows: int = 512):
    """preds: (B, C) float, target: (B,) int -> scalar float32 (reduction='mean')."""
    B, C = preds.shape
    lane, sub = 128, 8

    cp = max(lane, pl.cdiv(C, lane) * lane)          # lane-dense class axis
    itemsize = jnp.dtype(preds.dtype).itemsize
    # keep each (tb, cp) tile well inside scoped VMEM (it gets double-buffered)
    tile_budget = 8 * 1024 * 1024
    tb_cap = max(sub, (tile_budget // (cp * itemsize)) // sub * sub)
    tb = min(pl.cdiv(B, sub) * sub, tb_cap, max_block_rows)
    g = pl.cdiv(B, tb)
    bp = g * tb

    x = preds                                        # keep native dtype (bf16-friendly)
    if (bp, cp) != (B, C):
        x = jnp.pad(x, ((0, bp - B), (0, cp - C)))
    tgt = jnp.pad(target.astype(jnp.int32), (0, bp - B)).reshape(bp, 1)

    # TODO(synk): for vocabulary-scale C where a single (tb, cp) row tile no longer
    # fits VMEM, add a second "arbitrary" grid axis over C with online (flash-style)
    # max/LSE and weighted-sum accumulators.

    kernel = functools.partial(_ls_ce_kernel, epsilon=float(epsilon),
                               num_classes=C, batch=B, block_rows=tb)

    partials = pl.pallas_call(
        kernel,
        out_shape=jax.ShapeDtypeStruct((8, 128 * g), jnp.float32),
        grid=(g,),
        in_specs=[
            pl.BlockSpec((tb, cp), lambda i: (i, 0)),   # logits tile
            pl.BlockSpec((tb, 1), lambda i: (i, 0)),    # targets tile
        ],
        out_specs=pl.BlockSpec((8, 128), lambda i: (0, i)),
        compiler_params=pltpu.CompilerParams(
            dimension_semantics=("parallel",),
            vmem_limit_bytes=48 * 1024 * 1024,
        ),
    )(x, tgt)

    # one partial per row-block lives at column i*128 of row 0
    return jnp.sum(partials[0, 0::128]) / B


def _reference(preds, target, epsilon=0.1):
    logp = jax.nn.log_softmax(preds, axis=-1)
    loss = jnp.mean(-jnp.sum(logp, axis=-1))
    nll = jnp.mean(-jnp.take_along_axis(logp, target[:, None], axis=-1)[:, 0])
    n = preds.shape[-1]
    return epsilon * loss / n + (1.0 - epsilon) * nll


if __name__ == "__main__":
    key = jax.random.PRNGKey(0)
    kp, kt = jax.random.split(key)
    B, C = 8, 32                      # batch = 8, num_classes (hidden) = 32
    preds = jax.random.normal(kp, (B, C), dtype=jnp.float32)
    target = jax.random.randint(kt, (B,), 0, C, dtype=jnp.int32)

    out = label_smoothing_cross_entropy(preds, target, epsilon=0.1)
    out = jax.block_until_ready(out)

    ref = _reference(preds, target, epsilon=0.1)
    assert jnp.allclose(out, ref, atol=1e-5, rtol=1e-5), (out, ref)
    print("KERNEL_OK")
</pallas_src>

<mosaic_0001>
module attributes {stable_mosaic.version = 11 : i64} {
  func.func @_ls_ce_kernel(%arg0: i32, %arg1: memref<8x128xf32, #tpu.memory_space<vmem>>, %arg2: memref<8x1xi32, #tpu.memory_space<vmem>>, %arg3: memref<8x128xf32, #tpu.memory_space<vmem>>) attributes {dimension_semantics = [#tpu.dimension_semantics<parallel>], iteration_bounds = array<i64: 1>, scalar_prefetch = 0 : i64, scratch_operands = 0 : i64, tpu.core_type = #tpu.core_type<tc>, window_params = [{transform_indices = @transform_0, window_bounds = array<i64: 8, 128>}, {transform_indices = @transform_1, window_bounds = array<i64: 8, 1>}, {transform_indices = @transform_2, window_bounds = array<i64: 8, 128>}]} {
    %c0 = arith.constant 0 : index
    %c0_0 = arith.constant 0 : index
    %0 = vector.load %arg1[%c0, %c0_0] : memref<8x128xf32, #tpu.memory_space<vmem>>, vector<8x128xf32>
    %1 = tpu.iota {dimensions = array<i32: 1>} : vector<8x128xi32>
    %c32_i32 = arith.constant 32 : i32
    %2 = vector.broadcast %c32_i32 : i32 to vector<8x128xi32>
    %3 = arith.cmpi slt, %1, %2 : vector<8x128xi32>
    %cst = arith.constant -1.000000e+30 : f32
    %4 = vector.broadcast %cst : f32 to vector<8x128xf32>
    %5 = arith.select %3, %0, %4 : vector<8x128xi1>, vector<8x128xf32>
    %cst_1 = arith.constant dense<0xFF800000> : vector<8xf32>
    %6 = vector.multi_reduction <maximumf>, %5, %cst_1 [1] : vector<8x128xf32> to vector<8xf32>
    %7 = vector.shape_cast %6 : vector<8xf32> to vector<8x1xf32>
    %8 = vector.broadcast %7 : vector<8x1xf32> to vector<8x128xf32>
    %9 = arith.subf %5, %8 : vector<8x128xf32>
    %10 = math.exp %9 : vector<8x128xf32>
    %cst_2 = arith.constant dense<0.000000e+00> : vector<8xf32>
    %11 = vector.multi_reduction <add>, %10, %cst_2 [1] : vector<8x128xf32> to vector<8xf32>
    %12 = vector.shape_cast %11 : vector<8xf32> to vector<8x1xf32>
    %13 = math.log %12 : vector<8x1xf32>
    %14 = arith.addf %7, %13 : vector<8x1xf32>
    %c0_3 = arith.constant 0 : index
    %c0_4 = arith.constant 0 : index
    %15 = vector.load %arg2[%c0_3, %c0_4] : memref<8x1xi32, #tpu.memory_space<vmem>>, vector<8x1xi32>
    %16 = vector.broadcast %15 : vector<8x1xi32> to vector<8x128xi32>
    %17 = arith.cmpi eq, %1, %16 : vector<8x128xi32>
    %18 = arith.extui %17 : vector<8x128xi1> to vector<8x128xi32>
    %19 = arith.sitofp %18 : vector<8x128xi32> to vector<8x128xf32>
    %cst_5 = arith.constant 3.125000e-03 : f32
    %cst_6 = arith.constant 0.000000e+00 : f32
    %20 = vector.broadcast %cst_5 : f32 to vector<8x128xf32>
    %21 = vector.broadcast %cst_6 : f32 to vector<8x128xf32>
    %22 = arith.select %3, %20, %21 : vector<8x128xi1>, vector<8x128xf32>
    %cst_7 = arith.constant 0.899999976 : f32
    %23 = vector.broadcast %cst_7 : f32 to vector<8x128xf32>
    %24 = arith.mulf %23, %19 : vector<8x128xf32>
    %25 = arith.addf %22, %24 : vector<8x128xf32>
    %26 = arith.mulf %0, %25 : vector<8x128xf32>
    %cst_8 = arith.constant dense<0.000000e+00> : vector<8xf32>
    %27 = vector.multi_reduction <add>, %26, %cst_8 [1] : vector<8x128xf32> to vector<8xf32>
    %28 = vector.shape_cast %27 : vector<8xf32> to vector<8x1xf32>
    %29 = arith.subf %14, %28 : vector<8x1xf32>
    %c8_i32 = arith.constant 8 : i32
    %30 = arith.muli %arg0, %c8_i32 : i32
    %31 = tpu.iota {dimensions = array<i32: 0>} : vector<8x1xi32>
    %32 = vector.broadcast %30 : i32 to vector<8x1xi32>
    %33 = arith.addi %32, %31 : vector<8x1xi32>
    %c8_i32_9 = arith.constant 8 : i32
    %34 = vector.broadcast %c8_i32_9 : i32 to vector<8x1xi32>
    %35 = arith.cmpi slt, %33, %34 : vector<8x1xi32>
    %cst_10 = arith.constant 0.000000e+00 : f32
    %36 = vector.broadcast %cst_10 : f32 to vector<8x1xf32>
    %37 = arith.select %35, %29, %36 : vector<8x1xi1>, vector<8x1xf32>
    %38 = vector.shape_cast %37 : vector<8x1xf32> to vector<1x8x1xf32>
    %cst_11 = arith.constant dense<0.000000e+00> : vector<1xf32>
    %39 = vector.multi_reduction <add>, %38, %cst_11 [1, 2] : vector<1x8x1xf32> to vector<1xf32>
    %40 = vector.shape_cast %39 : vector<1xf32> to vector<1x1x1xf32>
    %41 = vector.extract %40[0, 0, 0] : f32 from vector<1x1x1xf32>
    %42 = vector.broadcast %41 : f32 to vector<8x128xf32>
    %c0_12 = arith.constant 0 : index
    %c0_13 = arith.constant 0 : index
    %43 = vector.load %arg3[%c0_12, %c0_13] : memref<8x128xf32, #tpu.memory_space<vmem>>, vector<8x128xf32>
    tpu.vector_store %arg3[%c0_12, %c0_13], %42 {strides = array<i32>} : memref<8x128xf32, #tpu.memory_space<vmem>>, vector<8x128xf32>,
    return
  }
  func.func @transform_0(%arg0: i32) -> (i32, i32) {
    %c0_i32 = arith.constant 0 : i32
    %c0_i32_0 = arith.constant 0 : i32
    return %arg0, %c0_i32 : i32, i32
  }
  func.func @transform_1(%arg0: i32) -> (i32, i32) {
    %c0_i32 = arith.constant 0 : i32
    %c0_i32_0 = arith.constant 0 : i32
    return %arg0, %c0_i32 : i32, i32
  }
  func.func @transform_2(%arg0: i32) -> (i32, i32) {
    %c0_i32 = arith.constant 0 : i32
    %c0_i32_0 = arith.constant 0 : i32
    return %c0_i32, %arg0 : i32, i32
  }
}

</mosaic_0001>

<bundles_post_ra>
// kernel: tpu_custom_call.1
= control target key start
LH: loop header
LB: loop body
LE: loop exit
PB: predicated region body
PF: predicated region fallthrough
CT: control target
= control target key end

     0   :  { %v13_v0 = vlaneseq  ;;  %s146_s0 = inlined_call_operand.vmem [shape: f32[8,128], index: 0, kind: input, shape index: {}]   ;;  %s147_s1 = inlined_call_operand.vmem [shape: s32[8,1], index: 1, kind: input, shape index: {}]   ;;  %s148_s2 = inlined_call_operand.hbm [shape: f32[8,128], index: 2, kind: output, shape index: {}]  }
   0x1   :  { %7 = vsyncpa [#allocation3], 0  ;;  %v110_v1 = vmov 0   ;;  %v12_v2 = vld [vmem:[%s146_s0] sm:$0xff]  ;;  %v111_v10 = vmov 0.0   ;;  %vm48_vm2 = vcmask 7168  }
   0x2   :  { %81 = vset.pattern.permute.xlu0 %v110_v1  ;;  %v14_v3 = vand.u32 127, %v13_v0  ;;  %v27_v5 = vld [vmem:[%s147_s1] sm:$0xff]  ;;  %s112_s0 = smov [#allocation2]  }
   0x3   :  { %s67_s1 = sshll.u32 %s112_s0, 4  ;;  %s68_s1 = int_to_ptr.vmem [resolvable:$true] %s67_s1 }
   0x4   :  { %vm15_vm0 = vcmp.lt.s32.totalorder %v14_v3, 32  ;;  %s86_s14 = scalar_lea.vmem %s68_s1, 128  ;;  %p91_p1 = scmp.lt.s32.totalorder %s68_s1, %s68_s1 }
   0x5   :  { %v16_v4 = vsel %vm15_vm0, %v12_v2, -1e+30  ;;  %v34_v11 = vsel %vm15_vm0, 0.003125, %v111_v10  ;;  %p87_p0 = scmp.ne.s32.totalorder %s68_s1, %s86_s14  ;;  %p92_p2 = scmp.lt.s32.totalorder %s86_s14, %s86_s14 }
   0x6   :  { %17 = vmax.xlane.f32.xlu0 %v16_v4 }
   0x7   :  { %p93_p3 = por %p92_p2, %p91_p1 }
   0x9   :  { %p94_p4 = pnand %p93_p3, %p87_p0 }
  0x1c   :  { %29 = vperm.xlu0 %81, %v27_v5  }
  0x93   :  { %v18_v6 = vpop.xlane.xlu0 %17 }
  0x94   :  { %v19_v7 = vsub.f32 %v16_v4, %v18_v6 }
  0x96   :  { %v20_v8 = vmul.f32 1.442695, %v19_v7 }
  0x98   :  { %82 = vpow2.f32 %v20_v8 }
  0x9b   :  { %v30_v9 = vpop.permute.xlu0 %29 }
  0x9c   :  { %vm31_vm1 = vcmp.eq.s32.totalorder %v14_v3, %v30_v9 }
  0x9d   :  { %v75_v12 = vsel %vm31_vm1, 1.0, %v111_v10 }
  0x9e   :  { %v35_v13 = vmul.f32 0.9, %v75_v12 }
  0xa0   :  { %v36_v14 = vadd.f32 %v35_v13, %v34_v11 }
  0xa2   :  { %v83_v15 = vpop.eup %82  ;;  %v37_v16 = vmul.f32 %v36_v14, %v12_v2 }
  0xa3   :  { %22 = vadd.xlane.f32.xlu1 %v83_v15 }
  0xa7   :  { %38 = vadd.xlane.f32.xlu1 %v37_v16 }
 0x130   :  { %v23_v17 = vpop.xlane.xlu1 %22 }
 0x131   :  { %84 = vlog2.f32 %v23_v17 }
 0x134   :  { %v39_v20 = vpop.xlane.xlu1 %38 }
 0x13b   :  { %v85_v18 = vpop.eup %84 }
 0x13c   :  { %v25_v19 = vmul.f32 0.6931472, %v85_v18 }
 0x13e   :  { %v26_v21 = vadd.f32 %v25_v19, %v18_v6 }
 0x140   :  { %v40_v22 = vsub.f32 %v26_v21, %v39_v20 }
 0x142   :  { %v49_v23 = vsel %vm48_vm2, %v40_v22, 0.0 }
 0x143   :  { %50 = vadd.xlane.f32.xlu1 %v49_v23 }
 0x1d0   :  { %v51_v24 = vpop.xlane.xlu1 %50 }
 0x1d1   :  { %v52_v25 = vrot.slane %v51_v24, 4 }
 0x1d3   :  { %v53_v26 = vadd.f32 %v52_v25, %v51_v24 }
 0x1d5   :  { %v54_v27 = vrot.slane %v53_v26, 2 }
 0x1d7   :  { %v55_v28 = vadd.f32 %v54_v27, %v53_v26 }
 0x1d9   :  { %v56_v29 = vrot.slane %v55_v28, 1 }
 0x1db   :  { %v57_v30 = vadd.f32 %v56_v29, %v55_v28 }
 0x1dd   :  { %76 = vpush %v57_v30 }
 0x20e   :  { %s77_s13 = spop %76 }
 0x20f   :  { %v59_v31 = vstv %s77_s13 }
 0x210   :  { %60 = vst [vmem:[#allocation2] sm:$0xff] %v59_v31 }
 0x211   :  { %97 = shalt.err (!%p94_p4)
}
 0x212   :  { %s98_s17 = scalar_lea.hbm %s148_s2, 128 }
 0x213   :  { %p99_p5 = scmp.ne.s32.totalorder %s148_s2, %s98_s17  ;;  %p102_p6 = scmp.lt.u32.totalorder %s98_s17, %s148_s2 }
 0x215   :  { %p104_p7 = pnand %p102_p6, %p99_p5 }
 0x217   :  { %107 = shalt.err (!%p104_p7)
}
 0x218   :  { %70 = dma.vmem_to_hbm [thread:$0]  %s68_s1, 128, %s148_s2, [#allocation3]  }
 0x219   :  { %108 = dma.done.wait [#allocation3], 128  }
 0x21a   :  { %109 = vsyncadd [#allocation3], 4294967168 }
 0x21b   :  { %74 = vsyncpa [#allocation3], 1 }

</bundles_post_ra>
